<compile_context>
chip_gen: v5e
topology: v5e:2x2
jax: 0.10.0
libtpu: 0.0.40
codegen_flags: <defaults>
</compile_context>

<pallas_src>
import functools

import jax
import jax.numpy as jnp
from jax.experimental import pallas as pl
from jax.experimental.pallas import tpu as pltpu


# ----------------------------------------------------------------------------
# Small helpers
# ----------------------------------------------------------------------------

def _round_up(x, m):
    return ((x + m - 1) // m) * m


def _cdiv(a, b):
    return (a + b - 1) // b


def _sublane_multiple(dtype):
    """Minimum native sublane tile for a dtype (f32:8, bf16:16, int8/fp8:32)."""
    itemsize = jnp.dtype(dtype).itemsize
    return {4: 8, 2: 16, 1: 32}.get(itemsize, 8)


def _pick_divisor_block(total, cap):
    """Largest multiple of 128 <= cap that divides `total` (total % 128 == 0)."""
    best = 128
    b = 128
    while b <= min(cap, total):
        if total % b == 0:
            best = b
        b += 128
    return best


def _vmem_capacity_bytes():
    try:
        info = pltpu.get_tpu_info()
        cap = int(getattr(info, "vmem_capacity_bytes", 0))
        if cap > 0:
            return cap
    except Exception:
        pass
    return 64 * 1024 * 1024  # conservative default (v7x per-TC VMEM)


def _usable_vmem_bytes():
    # ~85% of physical VMEM leaves room for compiler scratch / spill:
    #   v7x (64 MiB/TC)  -> ~54 MiB   ;   v5e/v6e (128 MiB) -> ~109 MiB
    return int(_vmem_capacity_bytes() * 0.85)


def _apply_activation(y, activation):
    if activation is None:
        return y
    a = activation.lower()
    if a == "none":
        return y
    if a == "relu":
        return jnp.maximum(y, 0.0)
    if a == "sigmoid":
        return jax.nn.sigmoid(y)
    if a == "tanh":
        return jnp.tanh(y)
    if a == "leakyrelu":
        return jnp.where(y >= 0.0, y, 0.01 * y)  # torch default negative_slope
    # TODO(synk): 'dice' activation needs learned per-feature alpha + batch stats; not wired here.
    raise NotImplementedError(f"activation {activation} not implemented")


# ----------------------------------------------------------------------------
# Parameter init / prep (prep is hoisted out of the per-call path)
# ----------------------------------------------------------------------------

def init_mlp_params(layers, key, init_method=None):
    """Deterministic parameter init matching MLPLayers' shapes.

    Returns list of (w, b) with w: (H_in, H_out) (transposed vs torch Linear.weight),
    b: (H_out,).
    """
    params = []
    for in_size, out_size in zip(layers[:-1], layers[1:]):
        key, kw, kb = jax.random.split(key, 3)
        if init_method == "norm":
            w = 0.01 * jax.random.normal(kw, (in_size, out_size), jnp.float32)
            b = jnp.zeros((out_size,), jnp.float32)
        else:
            # torch.nn.Linear default: U(-1/sqrt(in), 1/sqrt(in))
            bound = 1.0 / jnp.sqrt(in_size)
            w = jax.random.uniform(kw, (in_size, out_size), jnp.float32,
                                   minval=-bound, maxval=bound)
            b = jax.random.uniform(kb, (out_size,), jnp.float32,
                                   minval=-bound, maxval=bound)
        params.append((w, b))
    return params


def prepare_mlp_params(params, param_dtype=jnp.bfloat16):
    """One-time prep: zero-pad features to multiples of 128; weights -> param_dtype
    (bf16 by default: halves VMEM residency / DMA bytes), biases -> f32 (1, H_pad).

    Returns (padded_params, dims) where dims holds the original (H_in, H_out).
    Zero padding is exact: padded K rows of W are 0, padded output columns are
    dropped in the wrapper — so activation values in padded columns never leak.
    """
    padded, dims = [], []
    for w, b in params:
        h_in, h_out = w.shape
        h_in_p = _round_up(h_in, 128)
        h_out_p = _round_up(h_out, 128)
        w_dtype = param_dtype if param_dtype is not None else w.dtype
        w_p = jnp.zeros((h_in_p, h_out_p), w_dtype).at[:h_in, :h_out].set(
            w.astype(w_dtype))
        b_p = jnp.zeros((1, h_out_p), jnp.float32).at[0, :h_out].set(
            b.astype(jnp.float32))
        padded.append((w_p, b_p))
        dims.append((h_in, h_out))
    return padded, dims


# ----------------------------------------------------------------------------
# Fused kernel: the whole Linear+activation stack in one pallas_call
# ----------------------------------------------------------------------------

def _mlp_fused_kernel(*refs, num_layers, activation):
    """refs = (x_ref, w0, b0, w1, b1, ..., o_ref). One batch row-tile per grid step."""
    x_ref = refs[0]
    o_ref = refs[1 + 2 * num_layers]
    h = x_ref[...]
    for l in range(num_layers):
        w_ref = refs[1 + 2 * l]
        b_ref = refs[2 + 2 * l]
        # Cast lhs to the weight dtype (bf16 path on the MXU); accumulate in f32.
        y = jnp.dot(h.astype(w_ref.dtype), w_ref[...],
                    preferred_element_type=jnp.float32)
        y = y + b_ref[...]                    # (1, H_out_pad) broadcasts over rows
        h = _apply_activation(y, activation)  # activation after every Linear (incl. last)
    o_ref[...] = h.astype(o_ref.dtype)


def _run_fused(x_p, flat_params, num_layers, activation, tile, h0_pad, h_last_pad,
               vmem_limit, flops, transcendentals, bytes_accessed,
               single_buffer_params):
    n_pad = x_p.shape[0]
    grid = (n_pad // tile,)

    def resident_spec(shape):
        # Params never change across the grid -> single-buffer them (halves the
        # resident-param VMEM footprint vs the default 2-deep pipelining).
        if single_buffer_params:
            return pl.BlockSpec(shape, lambda i: (0, 0),
                                pipeline_mode=pl.Buffered(1))
        return pl.BlockSpec(shape, lambda i: (0, 0))

    in_specs = [pl.BlockSpec((tile, h0_pad), lambda i: (i, 0))]
    for l in range(num_layers):
        in_specs.append(resident_spec(flat_params[2 * l].shape))
        in_specs.append(resident_spec(flat_params[2 * l + 1].shape))
    out_spec = pl.BlockSpec((tile, h_last_pad), lambda i: (i, 0))

    kernel = functools.partial(_mlp_fused_kernel,
                               num_layers=num_layers, activation=activation)

    return pl.pallas_call(
        kernel,
        out_shape=jax.ShapeDtypeStruct((n_pad, h_last_pad), x_p.dtype),
        grid=grid,
        in_specs=in_specs,
        out_specs=out_spec,
        compiler_params=pltpu.CompilerParams(
            dimension_semantics=("parallel",),
            vmem_limit_bytes=vmem_limit,
        ),
        cost_estimate=pl.CostEstimate(
            flops=flops,
            transcendentals=transcendentals,
            bytes_accessed=bytes_accessed,
        ),
    )(x_p, *flat_params)


# ----------------------------------------------------------------------------
# Fallback: per-layer K/N-tiled matmul kernel (weight streaming) for stacks
# whose resident weights would not fit the per-generation VMEM budget.
# ----------------------------------------------------------------------------

def _linear_act_kernel(x_ref, w_ref, b_ref, o_ref, acc_ref, *, activation):
    @pl.when(pl.program_id(2) == 0)
    def _():
        acc_ref[...] = jnp.zeros_like(acc_ref)
    acc_ref[...] += jnp.dot(x_ref[...].astype(w_ref.dtype), w_ref[...],
                            preferred_element_type=jnp.float32)

    @pl.when(pl.program_id(2) == pl.num_programs(2) - 1)
    def _():
        y = acc_ref[...] + b_ref[...]
        o_ref[...] = _apply_activation(y, activation).astype(o_ref.dtype)


def _linear_act(x_p, w_p, b_p, tm, activation, out_dtype, usable):
    m, k = x_p.shape
    _, n_out = w_p.shape
    tn = _pick_divisor_block(n_out, 512)
    tk = _pick_divisor_block(k, 512)
    grid = (m // tm, n_out // tn, k // tk)

    x_bytes = jnp.dtype(x_p.dtype).itemsize
    w_bytes = jnp.dtype(w_p.dtype).itemsize
    o_bytes = jnp.dtype(out_dtype).itemsize
    vmem_needed = (2 * (tm * tk * x_bytes + tk * tn * w_bytes + tn * 4)
                   + 2 * tm * tn * o_bytes + tm * tn * 4 + 2 * 1024 * 1024)
    vmem_limit = int(min(max(vmem_needed, 16 * 1024 * 1024), usable))

    kernel = functools.partial(_linear_act_kernel, activation=activation)
    trans = m * n_out if (activation is not None and
                          activation.lower() in ("sigmoid", "tanh")) else 0
    return pl.pallas_call(
        kernel,
        out_shape=jax.ShapeDtypeStruct((m, n_out), out_dtype),
        grid=grid,
        in_specs=[pl.BlockSpec((tm, tk), lambda i, j, kk: (i, kk)),
                  pl.BlockSpec((tk, tn), lambda i, j, kk: (kk, j)),
                  pl.BlockSpec((1, tn), lambda i, j, kk: (0, j))],
        out_specs=pl.BlockSpec((tm, tn), lambda i, j, kk: (i, j)),
        scratch_shapes=[pltpu.VMEM((tm, tn), jnp.float32)],
        compiler_params=pltpu.CompilerParams(
            dimension_semantics=("parallel", "parallel", "arbitrary"),
            vmem_limit_bytes=vmem_limit,
        ),
        cost_estimate=pl.CostEstimate(
            flops=2 * m * k * n_out,
            transcendentals=trans,
            bytes_accessed=(m * k * x_bytes + k * n_out * w_bytes
                            + m * n_out * o_bytes),
        ),
    )(x_p, w_p, b_p)


def _mlp_per_layer(x2, padded_params, dims, activation, usable):
    n, h_in = x2.shape
    h0_pad = padded_params[0][0].shape[0]
    h_last = dims[-1][1]
    sub = _sublane_multiple(x2.dtype)

    tm = min(512, max(sub, _round_up(_cdiv(n, 2), sub)))
    n_pad = _round_up(n, tm)
    if n_pad == n and h0_pad == h_in:
        h = x2
    else:
        h = jnp.zeros((n_pad, h0_pad), x2.dtype).at[:n, :h_in].set(x2)

    for idx, (w_p, b_p) in enumerate(padded_params):
        last = idx == len(padded_params) - 1
        out_dtype = x2.dtype if last else jnp.float32
        h = _linear_act(h, w_p, b_p, tm, activation, out_dtype, usable)
    return h[:n, :h_last]


# ----------------------------------------------------------------------------
# Top-level forward
# ----------------------------------------------------------------------------

def mlp_fused(x2, padded_params, dims, activation="relu", tile_n_max=1024,
              force_per_layer=False):
    """MLP forward on a 2-D (N, H_in) input. Returns (N, H_out_last)."""
    n, h_in = x2.shape
    num_layers = len(padded_params)
    h0_pad = padded_params[0][0].shape[0]
    h_last = dims[-1][1]
    h_last_pad = padded_params[-1][0].shape[1]
    x_itemsize = jnp.dtype(x2.dtype).itemsize
    sub = _sublane_multiple(x2.dtype)

    usable = _usable_vmem_bytes()
    headroom = 2 * 1024 * 1024
    param_bytes = sum(int(w.size) * jnp.dtype(w.dtype).itemsize
                      + int(b.size) * jnp.dtype(b.dtype).itemsize
                      for w, b in padded_params)
    max_h_pad = max([h0_pad] + [w.shape[1] for w, _ in padded_params])

    # Per-row VMEM footprint: double-buffered x/out tiles + f32 activation slabs.
    per_row = (2 * h0_pad * x_itemsize + 2 * h_last_pad * x_itemsize
               + 3 * max_h_pad * 4)
    rows_budget = max(0, usable - param_bytes - headroom) // per_row
    fused_fits = (not force_per_layer) and rows_budget >= sub

    if not fused_fits:
        # Weight stack too large to keep fully VMEM-resident (or forced):
        # stream each layer through a K/N-tiled matmul kernel with accumulator.
        return _mlp_per_layer(x2, padded_params, dims, activation, usable)

    # Batch tile: as big as the VMEM budget allows (up to tile_n_max), rounded
    # to the dtype's sublane multiple, and chosen so that there are >= 2 row
    # tiles whenever possible (keeps both v7x TensorCores busy) while bounding
    # N over-padding.
    tile_cap = max(sub, min(tile_n_max, (rows_budget // sub) * sub))
    if n >= 2 * tile_cap:
        tile = tile_cap
    else:
        tile = max(sub, min(tile_cap, _round_up(_cdiv(n, 2), sub)))
    n_pad = _round_up(n, tile)

    # Skip the wrapper-side padded copy of x when no padding is needed.
    if n_pad == n and h0_pad == h_in:
        x_p = x2
    else:
        x_p = jnp.zeros((n_pad, h0_pad), x2.dtype).at[:n, :h_in].set(x2)

    flat_params = [t for wb in padded_params for t in wb]

    flops = 0
    transcendentals = 0
    for w_p, _ in padded_params:
        flops += 2 * n_pad * w_p.shape[0] * w_p.shape[1]
        if activation is not None and activation.lower() in ("sigmoid", "tanh"):
            transcendentals += n_pad * w_p.shape[1]
    bytes_accessed = (int(x_p.size) * x_itemsize + param_bytes
                      + n_pad * h_last_pad * x_itemsize)

    vmem_needed = tile * per_row + param_bytes + headroom
    vmem_limit = int(min(max(vmem_needed, 16 * 1024 * 1024), usable))

    run = functools.partial(
        _run_fused, x_p, flat_params, num_layers, activation, tile, h0_pad,
        h_last_pad, vmem_limit, flops, transcendentals, bytes_accessed)
    try:
        out_p = run(single_buffer_params=True)
    except Exception:
        # Safety net: fall back to default (double) buffering of the params.
        out_p = run(single_buffer_params=False)

    return out_p[:n, :h_last]


def make_mlp_forward(params, activation="relu", dropout=0.0, bn=False,
                     param_dtype=jnp.bfloat16, tile_n_max=1024,
                     force_per_layer=False):
    """Build a forward(x) closure with padding/casting prep hoisted out of the
    per-call path (prep runs exactly once here).

    Matches MLPLayers eval-mode semantics: dropout (p=0 / eval) is identity.
    """
    # TODO(synk): bn=True (BatchNorm1d) path not implemented.
    # TODO(synk): training-mode dropout masking not implemented (identity here).
    del dropout, bn
    padded_params, dims = prepare_mlp_params(params, param_dtype)

    def forward(x):
        lead = x.shape[:-1]
        x2 = x.reshape(-1, x.shape[-1])
        out2 = mlp_fused(x2, padded_params, dims, activation=activation,
                         tile_n_max=tile_n_max, force_per_layer=force_per_layer)
        return out2.reshape(*lead, dims[-1][1])

    return forward


def mlp_layers_forward(x, params, activation="relu", dropout=0.0, **kw):
    """One-shot convenience wrapper (re-prepares params every call; prefer
    make_mlp_forward for repeated use)."""
    return make_mlp_forward(params, activation=activation, dropout=dropout, **kw)(x)


if __name__ == "__main__":
    layers = [64, 32, 16]
    batch = 128

    key = jax.random.PRNGKey(0)
    key, kx = jax.random.split(key)
    x = jax.random.normal(kx, (batch, layers[0]), jnp.float32)

    params = init_mlp_params(layers, key, init_method=None)

    # Fused (VMEM-resident weights) path.
    fwd = make_mlp_forward(params, activation="relu", dropout=0.0)
    out = jax.block_until_ready(fwd(x))

    # Reference mirrors the kernel math: bf16 weights / bf16 matmul inputs,
    # f32 accumulation, f32 bias add + relu after every Linear.
    ref = x
    for w, b in params:
        y = jnp.dot(ref.astype(jnp.bfloat16), w.astype(jnp.bfloat16),
                    preferred_element_type=jnp.float32) + b
        ref = jnp.maximum(y, 0.0)

    assert out.shape == (batch, layers[-1])
    assert jnp.allclose(out, ref, atol=2e-3, rtol=2e-3)

    # Also exercise the weight-streaming fallback (per-layer tiled matmul).
    fwd_stream = make_mlp_forward(params, activation="relu", dropout=0.0,
                                  force_per_layer=True)
    out2 = jax.block_until_ready(fwd_stream(x))
    assert out2.shape == (batch, layers[-1])
    assert jnp.allclose(out2, ref, atol=2e-3, rtol=2e-3)

    print("KERNEL_OK")
</pallas_src>

<mosaic_0001>
module attributes {stable_mosaic.version = 11 : i64} {
  func.func @_mlp_fused_kernel(%arg0: i32, %arg1: memref<64x128xf32, #tpu.memory_space<vmem>>, %arg2: memref<128x128xbf16, #tpu.memory_space<vmem>>, %arg3: memref<1x128xf32, #tpu.memory_space<vmem>>, %arg4: memref<128x128xbf16, #tpu.memory_space<vmem>>, %arg5: memref<1x128xf32, #tpu.memory_space<vmem>>, %arg6: memref<64x128xf32, #tpu.memory_space<vmem>>) attributes {dimension_semantics = [#tpu.dimension_semantics<parallel>], iteration_bounds = array<i64: 2>, scalar_prefetch = 0 : i64, scratch_operands = 0 : i64, tpu.core_type = #tpu.core_type<tc>, window_params = [{transform_indices = @transform_0, window_bounds = array<i64: 64, 128>}, {pipeline_mode = #tpu.pipeline_mode<synchronous>, transform_indices = @transform_1, window_bounds = array<i64: 128, 128>}, {pipeline_mode = #tpu.pipeline_mode<synchronous>, transform_indices = @transform_2, window_bounds = array<i64: 1, 128>}, {pipeline_mode = #tpu.pipeline_mode<synchronous>, transform_indices = @transform_3, window_bounds = array<i64: 128, 128>}, {pipeline_mode = #tpu.pipeline_mode<synchronous>, transform_indices = @transform_4, window_bounds = array<i64: 1, 128>}, {transform_indices = @transform_5, window_bounds = array<i64: 64, 128>}]} {
    %c0 = arith.constant 0 : index
    %c0_0 = arith.constant 0 : index
    %0 = vector.load %arg1[%c0, %c0_0] : memref<64x128xf32, #tpu.memory_space<vmem>>, vector<64x128xf32>
    %1 = arith.truncf %0 : vector<64x128xf32> to vector<64x128xbf16>
    %c0_1 = arith.constant 0 : index
    %c0_2 = arith.constant 0 : index
    %2 = vector.load %arg2[%c0_1, %c0_2] : memref<128x128xbf16, #tpu.memory_space<vmem>>, vector<128x128xbf16>
    %cst = arith.constant dense<0.000000e+00> : vector<64x128xf32>
    %3 = tpu.matmul %1, %2, %cst {dimension_numbers = #tpu.dot_dimension_numbers<[1], [0], [0], [1], [0, 0, 1, 1], [], []>} : vector<64x128xbf16>, vector<128x128xbf16>, vector<64x128xf32> -> vector<64x128xf32>
    %c0_3 = arith.constant 0 : index
    %c0_4 = arith.constant 0 : index
    %4 = vector.load %arg3[%c0_3, %c0_4] : memref<1x128xf32, #tpu.memory_space<vmem>>, vector<1x128xf32>
    %5 = vector.broadcast %4 : vector<1x128xf32> to vector<64x128xf32>
    %6 = arith.addf %3, %5 : vector<64x128xf32>
    %cst_5 = arith.constant 0.000000e+00 : f32
    %7 = vector.broadcast %cst_5 : f32 to vector<64x128xf32>
    %8 = arith.maximumf %6, %7 : vector<64x128xf32>
    %9 = arith.truncf %8 : vector<64x128xf32> to vector<64x128xbf16>
    %c0_6 = arith.constant 0 : index
    %c0_7 = arith.constant 0 : index
    %10 = vector.load %arg4[%c0_6, %c0_7] : memref<128x128xbf16, #tpu.memory_space<vmem>>, vector<128x128xbf16>
    %cst_8 = arith.constant dense<0.000000e+00> : vector<64x128xf32>
    %11 = tpu.matmul %9, %10, %cst_8 {dimension_numbers = #tpu.dot_dimension_numbers<[1], [0], [0], [1], [0, 0, 1, 1], [], []>} : vector<64x128xbf16>, vector<128x128xbf16>, vector<64x128xf32> -> vector<64x128xf32>
    %c0_9 = arith.constant 0 : index
    %c0_10 = arith.constant 0 : index
    %12 = vector.load %arg5[%c0_9, %c0_10] : memref<1x128xf32, #tpu.memory_space<vmem>>, vector<1x128xf32>
    %13 = vector.broadcast %12 : vector<1x128xf32> to vector<64x128xf32>
    %14 = arith.addf %11, %13 : vector<64x128xf32>
    %cst_11 = arith.constant 0.000000e+00 : f32
    %15 = vector.broadcast %cst_11 : f32 to vector<64x128xf32>
    %16 = arith.maximumf %14, %15 : vector<64x128xf32>
    %c0_12 = arith.constant 0 : index
    %c0_13 = arith.constant 0 : index
    %17 = vector.load %arg6[%c0_12, %c0_13] : memref<64x128xf32, #tpu.memory_space<vmem>>, vector<64x128xf32>
    tpu.vector_store %arg6[%c0_12, %c0_13], %16 {strides = array<i32>} : memref<64x128xf32, #tpu.memory_space<vmem>>, vector<64x128xf32>,
    return
  }
  func.func @transform_0(%arg0: i32) -> (i32, i32) {
    %c0_i32 = arith.constant 0 : i32
    %c0_i32_0 = arith.constant 0 : i32
    return %arg0, %c0_i32 : i32, i32
  }
  func.func @transform_1(%arg0: i32) -> (i32, i32) {
    %c0_i32 = arith.constant 0 : i32
    %c0_i32_0 = arith.constant 0 : i32
    %c0_i32_1 = arith.constant 0 : i32
    return %c0_i32, %c0_i32_0 : i32, i32
  }
  func.func @transform_2(%arg0: i32) -> (i32, i32) {
    %c0_i32 = arith.constant 0 : i32
    %c0_i32_0 = arith.constant 0 : i32
    %c0_i32_1 = arith.constant 0 : i32
    return %c0_i32, %c0_i32_0 : i32, i32
  }
  func.func @transform_3(%arg0: i32) -> (i32, i32) {
    %c0_i32 = arith.constant 0 : i32
    %c0_i32_0 = arith.constant 0 : i32
    %c0_i32_1 = arith.constant 0 : i32
    return %c0_i32, %c0_i32_0 : i32, i32
  }
  func.func @transform_4(%arg0: i32) -> (i32, i32) {
    %c0_i32 = arith.constant 0 : i32
    %c0_i32_0 = arith.constant 0 : i32
    %c0_i32_1 = arith.constant 0 : i32
    return %c0_i32, %c0_i32_0 : i32, i32
  }
  func.func @transform_5(%arg0: i32) -> (i32, i32) {
    %c0_i32 = arith.constant 0 : i32
    %c0_i32_0 = arith.constant 0 : i32
    return %arg0, %c0_i32 : i32, i32
  }
}

module attributes {stable_mosaic.version = 11 : i64} {
  func.func @_mlp_fused_kernel(%arg0: i32, %arg1: memref<64x128xf32, #tpu.memory_space<vmem>>, %arg2: memref<128x128xbf16, #tpu.memory_space<vmem>>, %arg3: memref<1x128xf32, #tpu.memory_space<vmem>>, %arg4: memref<128x128xbf16, #tpu.memory_space<vmem>>, %arg5: memref<1x128xf32, #tpu.memory_space<vmem>>, %arg6: memref<64x128xf32, #tpu.memory_space<vmem>>) attributes {dimension_semantics = [#tpu.dimension_semantics<parallel>], iteration_bounds = array<i64: 2>, scalar_prefetch = 0 : i64, scratch_operands = 0 : i64, tpu.core_type = #tpu.core_type<tc>, window_params = [{transform_indices = @transform_0, window_bounds = array<i64: 64, 128>}, {pipeline_mode = #tpu.pipeline_mode<synchronous>, transform_indices = @transform_1, window_bounds = array<i64: 128, 128>}, {pipeline_mode = #tpu.pipeline_mode<synchronous>, transform_indices = @transform_2, window_bounds = array<i64: 1, 128>}, {pipeline_mode = #tpu.pipeline_mode<synchronous>, transform_indices = @transform_3, window_bounds = array<i64: 128, 128>}, {pipeline_mode = #tpu.pipeline_mode<synchronous>, transform_indices = @transform_4, window_bounds = array<i64: 1, 128>}, {transform_indices = @transform_5, window_bounds = array<i64: 64, 128>}]} {
    %c0 = arith.constant 0 : index
    %c0_0 = arith.constant 0 : index
    %0 = vector.load %arg1[%c0, %c0_0] : memref<64x128xf32, #tpu.memory_space<vmem>>, vector<64x128xf32>
    %1 = arith.truncf %0 : vector<64x128xf32> to vector<64x128xbf16>
    %c0_1 = arith.constant 0 : index
    %c0_2 = arith.constant 0 : index
    %2 = vector.load %arg2[%c0_1, %c0_2] : memref<128x128xbf16, #tpu.memory_space<vmem>>, vector<128x128xbf16>
    %cst = arith.constant dense<0.000000e+00> : vector<64x128xf32>
    %3 = tpu.matmul %1, %2, %cst {dimension_numbers = #tpu.dot_dimension_numbers<[1], [0], [0], [1], [0, 0, 1, 1], [], []>} : vector<64x128xbf16>, vector<128x128xbf16>, vector<64x128xf32> -> vector<64x128xf32>
    %c0_3 = arith.constant 0 : index
    %c0_4 = arith.constant 0 : index
    %4 = vector.load %arg3[%c0_3, %c0_4] : memref<1x128xf32, #tpu.memory_space<vmem>>, vector<1x128xf32>
    %5 = vector.broadcast %4 : vector<1x128xf32> to vector<64x128xf32>
    %6 = arith.addf %3, %5 : vector<64x128xf32>
    %cst_5 = arith.constant 0.000000e+00 : f32
    %7 = vector.broadcast %cst_5 : f32 to vector<64x128xf32>
    %8 = arith.maximumf %6, %7 : vector<64x128xf32>
    %9 = arith.truncf %8 : vector<64x128xf32> to vector<64x128xbf16>
    %c0_6 = arith.constant 0 : index
    %c0_7 = arith.constant 0 : index
    %10 = vector.load %arg4[%c0_6, %c0_7] : memref<128x128xbf16, #tpu.memory_space<vmem>>, vector<128x128xbf16>
    %cst_8 = arith.constant dense<0.000000e+00> : vector<64x128xf32>
    %11 = tpu.matmul %9, %10, %cst_8 {dimension_numbers = #tpu.dot_dimension_numbers<[1], [0], [0], [1], [0, 0, 1, 1], [], []>} : vector<64x128xbf16>, vector<128x128xbf16>, vector<64x128xf32> -> vector<64x128xf32>
    %c0_9 = arith.constant 0 : index
    %c0_10 = arith.constant 0 : index
    %12 = vector.load %arg5[%c0_9, %c0_10] : memref<1x128xf32, #tpu.memory_space<vmem>>, vector<1x128xf32>
    %13 = vector.broadcast %12 : vector<1x128xf32> to vector<64x128xf32>
    %14 = arith.addf %11, %13 : vector<64x128xf32>
    %cst_11 = arith.constant 0.000000e+00 : f32
    %15 = vector.broadcast %cst_11 : f32 to vector<64x128xf32>
    %16 = arith.maximumf %14, %15 : vector<64x128xf32>
    %c0_12 = arith.constant 0 : index
    %c0_13 = arith.constant 0 : index
    %17 = vector.load %arg6[%c0_12, %c0_13] : memref<64x128xf32, #tpu.memory_space<vmem>>, vector<64x128xf32>
    tpu.vector_store %arg6[%c0_12, %c0_13], %16 {strides = array<i32>} : memref<64x128xf32, #tpu.memory_space<vmem>>, vector<64x128xf32>,
    return
  }
  func.func @transform_0(%arg0: i32) -> (i32, i32) {
    %c0_i32 = arith.constant 0 : i32
    %c0_i32_0 = arith.constant 0 : i32
    return %arg0, %c0_i32 : i32, i32
  }
  func.func @transform_1(%arg0: i32) -> (i32, i32) {
    %c0_i32 = arith.constant 0 : i32
    %c0_i32_0 = arith.constant 0 : i32
    %c0_i32_1 = arith.constant 0 : i32
    return %c0_i32, %c0_i32_0 : i32, i32
  }
  func.func @transform_2(%arg0: i32) -> (i32, i32) {
    %c0_i32 = arith.constant 0 : i32
    %c0_i32_0 = arith.constant 0 : i32
    %c0_i32_1 = arith.constant 0 : i32
    return %c0_i32, %c0_i32_0 : i32, i32
  }
  func.func @transform_3(%arg0: i32) -> (i32, i32) {
    %c0_i32 = arith.constant 0 : i32
    %c0_i32_0 = arith.constant 0 : i32
    %c0_i32_1 = arith.constant 0 : i32
    return %c0_i32, %c0_i32_0 : i32, i32
  }
  func.func @transform_4(%arg0: i32) -> (i32, i32) {
    %c0_i32 = arith.constant 0 : i32
    %c0_i32_0 = arith.constant 0 : i32
    %c0_i32_1 = arith.constant 0 : i32
    return %c0_i32, %c0_i32_0 : i32, i32
  }
  func.func @transform_5(%arg0: i32) -> (i32, i32) {
    %c0_i32 = arith.constant 0 : i32
    %c0_i32_0 = arith.constant 0 : i32
    return %arg0, %c0_i32 : i32, i32
  }
}

</mosaic_0001>

<bundles_post_ra>
// kernel: tpu_custom_call.1
= control target key start
LH: loop header
LB: loop body
LE: loop exit
PB: predicated region body
PF: predicated region fallthrough
CT: control target
= control target key end

     0   :  { %10 = vsyncpa [#allocation3], 0  ;;  %s1185_s0 = inlined_call_operand.hbm [shape: f32[128,128], index: 0, kind: input, shape index: {}]   ;;  %s1186_s1 = inlined_call_operand.hbm [shape: bf16[128,128], index: 1, kind: input, shape index: {}]   ;;  %s1187_s2 = inlined_call_operand.vmem [shape: f32[1,128], index: 2, kind: input, shape index: {}]   ;;  %s1188_s3 = inlined_call_operand.hbm [shape: bf16[128,128], index: 3, kind: input, shape index: {}]   ;;  %s1189_s4 = inlined_call_operand.vmem [shape: f32[1,128], index: 4, kind: input, shape index: {}]   ;;  %s1190_s5 = inlined_call_operand.hbm [shape: f32[128,128], index: 5, kind: output, shape index: {}]  }
   0x1   :  { %12 = vsyncpa [#allocation3 + $0x1], 0 }
   0x2   :  { %13 = vsyncpa [#allocation6], 0 }
   0x3   :  { %14 = vsyncpa [#allocation4], 0 }
   0x4   :  { %16 = vsyncpa [#allocation4 + $0x1], 0  ;;  %s1013_s18 = smov 0   ;;  %s1015_s19 = smov 0  }
   0x5   :  { %s1017_s20 = smov 0   ;;  %s1019_s21 = smov 0  }
   0x6 LB: > { %s1034_s22 = sadd.s32 4294967295, %s973_s21   ;;  %s622_s23 = sadd.s32 4294967294, %s973_s21   ;;  %s973_s21 = sphi %s1019_s21, %s1200_s21   ;;  %s969_s20 = sphi %s1017_s20, %s1199_s20   ;;  %s965_s19 = sphi %s1015_s19, %s1198_s19   ;;  %s961_s18 = sphi %s1013_s18, %s1197_s18  }
   0x7   : > { %p42_p0 = scmp.ne.s32.totalorder %s965_s19, %s961_s18  ;;  %p43_p1 = scmp.eq.s32.totalorder %s1034_s22, 0 }
   0x8   : > { %p150_p2 = scmp.eq.s32.totalorder %s1034_s22, 1  ;;  %p156_p3 = scmp.eq.s32.totalorder %s622_s23, 1 }
   0x9   : > { %p1043_p4 = por %p43_p1, %p42_p0  ;;  %p623_p5 = scmp.ge.s32.totalorder %s973_s21, 1 }
   0xa   : > { %p1048_p6 = por %p156_p3, %p42_p0  ;;  %p163_p7 = scmp.lt.s32.totalorder %s973_s21, 3 }
   0xb   : > { %s174_s28 = sshll.u32 %s1186_s1, 4  ;;  %s975_s30 = smov [#allocation5]   ;;  %s175_s28 = int_to_ptr.hbm [resolvable:$true] %s174_s28 }
   0xc   : > { %p1056_p8 = pnand %p623_p5, %p163_p7  ;;  %s176_s6 = sshll.u32 %s975_s30, 4  ;;  %s177_s6 = int_to_ptr.vmem [resolvable:$true] %s176_s6 }
   0xd   : > { %s191_s9 = sshll.u32 %s1188_s3, 4  ;;  %s976_s10 = smov 64   ;;  %s192_s9 = int_to_ptr.hbm [resolvable:$true] %s191_s9 }
   0xe   : > { %p750_p9 = pneg %p1056_p8  ;;  %s977_s11 = smov 4  }
   0xf   : > { %s978_s12 = smov [#allocation7]   ;;  %s1069_s14 = sadd.s32 1, %s973_s21  }
  0x10   : > { %p751_p10 = pnand %p750_p9, %p43_p1  ;;  %s193_s13 = sshll.u32 %s978_s12, 4  ;;  %s194_s13 = int_to_ptr.vmem [resolvable:$true] %s193_s13 }
  0x11   : > { %s29_s15 = sadd.s32 1, %s969_s20  ;;  %s26_s16 = ssub.s32 %s973_s21, %s1069_s14 }
  0x12   : > { %753 = dma.hbm_to_vmem [thread:$0]  (!%p751_p10), %s175_s28, 1024, %s177_s6, [#allocation6], %s976_s10, %s976_s10, %s977_s11  }
  0x13   : > { %756 = dma.hbm_to_vmem [thread:$0]  (!%p751_p10), %s192_s9, 1024, %s194_s13, [#allocation6], %s976_s10, %s976_s10, %s977_s11  }
  0x14   : > { %p36_p12 = scmp.ne.s32.totalorder %s969_s20, %s965_s19  ;;  %p27_p13 = scmp.eq.s32.totalorder %s26_s16, 0 }
  0x15   : > { %p37_p0 = scmp.eq.s32.totalorder %s973_s21, 0  ;;  %p767_p5 = scmp.lt.s32.totalorder %s973_s21, 2 }
  0x16   : > { %p1079_p3 = por %p150_p2, %p36_p12  ;;  %s210_s26 = sand.u32 1, %s969_s20  }
  0x17   : > { %s1085_s23 = scalar_select %p27_p13, %s969_s20, %s29_s15  }
  0x18   : > { %p38_p7 = por %p37_p0, %p36_p12  ;;  %s627_s27 = sshll.u32 %s210_s26, 6 }
  0x19   : > { %s704_s28 = sshll.u32 %s973_s21, 6  ;;  %s214_s8 = scalar_lea.vmem [#allocation2], %s627_s27 }
  0x1a   : > { %s219_s7 = scalar_lea.hbm %s1185_s0, %s704_s28  ;;  %s222_s9 = sshll.u32 %s214_s8, 4  ;;  %s223_s9 = int_to_ptr.vmem [resolvable:$true] %s222_s9 }
  0x1b   : > { %s220_s10 = sshll.u32 %s219_s7, 4  ;;  %p1092_p2 = pnand %p767_p5, %p38_p7  ;;  %s221_s10 = int_to_ptr.hbm [resolvable:$true] %s220_s10 }
  0x1c   : > { %s211_s12 = scalar_lea.sflag [#allocation3], %s210_s26  ;;  %s873_s13 = sshra.s32 %s221_s10, 4  ;;  %s874_s13 = int_to_ptr.hbm [resolvable:$true] %s873_s13 }
  0x1d   : > { %s875_s15 = scalar_lea.hbm %s874_s13, 64  ;;  %p877_p10 = pneg %p1092_p2 }
  0x1e   : > { %p876_p9 = scmp.ne.s32.totalorder %s874_s13, %s875_s15  ;;  %s880_s28 = scalar_lea.hbm %s1185_s0, 128 }
  0x1f   : > { %p881_p0 = scmp.lt.s32.totalorder %s874_s13, %s1185_s0  ;;  %p882_p5 = scmp.lt.s32.totalorder %s880_s28, %s875_s15 }
  0x20   : > { %p878_p12 = pnand %p877_p10, %p876_p9 }
  0x21   : > { %p883_p7 = por %p882_p5, %p881_p0 }
  0x22   : > { %p879_p13 = pneg %p878_p12 }
  0x24   : > { %p884_p11 = pnand %p883_p7, %p879_p13 }
  0x26   : > { %887 = shalt.err (!%p884_p11)
}
  0x27   : > { %s979_s26 = smov 128   ;;  %s980_s7 = smov 8  }
  0x28   : > { %760 = dma.hbm_to_vmem [thread:$0]  (!%p1092_p2), %s221_s10, 1024, %s223_s9, %s211_s12, %s979_s26, %s979_s26, %s980_s7  }
  0x29   : > { %234 = sbr.rel (%p1056_p8) target bundleno = 391 (0x187), region = 40  ;;  %s1109_s8 = sand.u32 (!%p1056_p8), 1, %s965_s19  }
  0x2a   : > { %s631_s13 = sshll.u32 (!%p1056_p8), %s1109_s8, 6  ;;  %s237_s15 = scalar_lea.sflag (!%p1056_p8), [#allocation3], %s1109_s8 }
  0x2b   : > { %s1115_s16 = scalar_lea.vmem (!%p1056_p8), [#allocation2], %s631_s13 }
  0x2e   : > { %948 = dma.done.wait (%p1043_p4), %s237_s15, 1024  }
  0x2f   : > { %950 = vsyncadd (%p1043_p4), %s237_s15, 4294966272 }
  0x30   : > { %952 = dma.done.wait (%p43_p1), [#allocation6], 2048  }
  0x31   : > { %954 = vsyncadd (%p43_p1), [#allocation6], 4294965248  ;;  %v712_v0 = vld [vmem:[#allocation5 + $0x38] sm:$0xff]  ;;  %v711_v1 = vld [vmem:[#allocation5 + $0x30] sm:$0xff]  ;;  %s1141_s11 = scalar_lea.vmem [#allocation8], %s631_s13  ;;  %s721_s12 = sshll.u32 %s1034_s22, 6 }
  0x32   : > { %360 = vmatpush.bf16.msra.mxu0 %v712_v0  ;;  %722 = vmatpush.bf16.msra.mxu2 %v712_v0  ;;  %v710_v2 = vld [vmem:[#allocation5 + $0x28] sm:$0xff]  ;;  %v709_v3 = vld [vmem:[#allocation5 + $0x20] sm:$0xff]  ;;  %v708_v4 = vld [vmem:[#allocation5 + $0x18] sm:$0xff]  ;;  %s526_s30 = scalar_lea.hbm %s1190_s5, %s721_s12  ;;  %s527_s6 = sshll.u32 %s1141_s11, 4  ;;  %s528_s6 = int_to_ptr.vmem [resolvable:$true] %s527_s6 }
  0x33   : > { %v720_v5 = vld [vmem:[#allocation7 + $0x38] sm:$0xff]  ;;  %v707_v6 = vld [vmem:[#allocation5 + $0x10] sm:$0xff]  ;;  %v706_v8 = vld [vmem:[#allocation5 + $0x8] sm:$0xff]  ;;  %s529_s26 = sshll.u32 %s526_s30, 4  ;;  %s515_s7 = scalar_lea.sflag [#allocation4], %s1109_s8  ;;  %s530_s26 = int_to_ptr.hbm [resolvable:$true] %s529_s26 }
  0x34   : > { %469 = vmatpush.bf16.msra.mxu1 %v720_v5  ;;  %v719_v7 = vld [vmem:[#allocation7 + $0x30] sm:$0xff]  ;;  %730 = vmatpush.bf16.msra.mxu3 %v720_v5  ;;  %v718_v9 = vld [vmem:[#allocation7 + $0x28] sm:$0xff]  ;;  %v705_v10 = vld [vmem:[#allocation5] sm:$0xff]  ;;  %s917_s13 = sshra.s32 %s530_s26, 4  ;;  %s923_s24 = scalar_lea.hbm %s1190_s5, 128  ;;  %s918_s13 = int_to_ptr.hbm [resolvable:$true] %s917_s13 }
  0x35   : > { %v280_v11 = vld [vmem:[%s1115_s16] sm:$0xff]  ;;  %v281_v12 = vld [vmem:[%s1115_s16 + $0x8] sm:$0xff]  ;;  %v282_v18 = vld [vmem:[%s1115_s16 + $0x10] sm:$0xff]  ;;  %s919_s15 = scalar_lea.hbm %s918_s13, 64  ;;  %p924_p11 = scmp.lt.s32.totalorder %s918_s13, %s1190_s5 }
  0x36   : > { %361 = vmatpush.bf16.msra.mxu0 %v711_v1  ;;  %723 = vmatpush.bf16.msra.mxu2 %v711_v1  ;;  %v284_v13 = vld [vmem:[%s1115_s16 + $0x20] sm:$0xff]  ;;  %v285_v14 = vld [vmem:[%s1115_s16 + $0x28] sm:$0xff]  ;;  %v288_v16 = vpack.c.bf16 %v281_v12, %v280_v11  ;;  %v283_v19 = vld [vmem:[%s1115_s16 + $0x18] sm:$0xff]  ;;  %p920_p1 = scmp.ne.s32.totalorder %s918_s13, %s919_s15  ;;  %p925_p2 = scmp.lt.s32.totalorder %s923_s24, %s919_s15 }
  0x37   : > { %v717_v15 = vld [vmem:[#allocation7 + $0x20] sm:$0xff]  ;;  %v290_v17 = vpack.c.bf16 %v285_v14, %v284_v13  ;;  %v286_v20 = vld [vmem:[%s1115_s16 + $0x30] sm:$0xff]  ;;  %v287_v21 = vld [vmem:[%s1115_s16 + $0x38] sm:$0xff]  ;;  %v289_v22 = vpack.c.bf16 %v283_v19, %v282_v18 }
  0x38   : > { %470 = vmatpush.bf16.msra.mxu1 %v719_v7  ;;  %731 = vmatpush.bf16.msra.mxu3 %v719_v7  ;;  %v291_v23 = vpack.c.bf16 %v287_v21, %v286_v20  ;;  %v716_v24 = vld [vmem:[#allocation7 + $0x18] sm:$0xff]  ;;  %v715_v25 = vld [vmem:[#allocation7 + $0x10] sm:$0xff]  ;;  %v714_v26 = vld [vmem:[#allocation7 + $0x8] sm:$0xff]  ;;  %p921_p4 = pnand %p920_p1, %p1079_p3  ;;  %p926_p9 = por %p925_p2, %p924_p11 }
  0x39   : > { %v713_v27 = vld [vmem:[#allocation7] sm:$0xff] }
  0x3a   : > { %362 = vmatpush.bf16.msra.mxu0 %v710_v2  ;;  %724 = vmatpush.bf16.msra.mxu2 %v710_v2  ;;  %v811_v29 = vld [vmem:[%s1187_s2] ss:$0 sm:$0xff]  ;;  %p922_p8 = pneg %p921_p4 }
  0x3b   : > { %v812_v57 = vld [vmem:[%s1189_s4] ss:$0 sm:$0xff] }
  0x3c   : > { %471 = vmatpush.bf16.msra.mxu1 %v718_v9  ;;  %732 = vmatpush.bf16.msra.mxu3 %v718_v9  ;;  %p927_p10 = pnand %p926_p9, %p922_p8 }
  0x3e   : > { %363 = vmatpush.bf16.msra.mxu0 %v709_v3  ;;  %725 = vmatpush.bf16.msra.mxu2 %v709_v3 }
  0x40   : > { %472 = vmatpush.bf16.msra.mxu1 %v717_v15  ;;  %733 = vmatpush.bf16.msra.mxu3 %v717_v15 }
  0x42   : > { %364 = vmatpush.bf16.msra.mxu0 %v708_v4  ;;  %726 = vmatpush.bf16.msra.mxu2 %v708_v4 }
  0x44   : > { %473 = vmatpush.bf16.msra.mxu1 %v716_v24  ;;  %734 = vmatpush.bf16.msra.mxu3 %v716_v24 }
  0x46   : > { %365 = vmatpush.bf16.msra.mxu0 %v707_v6  ;;  %727 = vmatpush.bf16.msra.mxu2 %v707_v6 }
  0x48   : > { %474 = vmatpush.bf16.msra.mxu1 %v715_v25  ;;  %735 = vmatpush.bf16.msra.mxu3 %v715_v25 }
  0x4a   : > { %366 = vmatpush.bf16.msra.mxu0 %v706_v8  ;;  %728 = vmatpush.bf16.msra.mxu2 %v706_v8 }
  0x4c   : > { %475 = vmatpush.bf16.msra.mxu1 %v714_v26  ;;  %736 = vmatpush.bf16.msra.mxu3 %v714_v26 }
  0x4e   : > { %367 = vmatpush.bf16.msra.mxu0 %v705_v10  ;;  %729 = vmatpush.bf16.msra.mxu2 %v705_v10 }
  0x50   : > { %476 = vmatpush.bf16.msra.mxu1 %v713_v27  ;;  %737 = vmatpush.bf16.msra.mxu3 %v713_v27 }
  0x51   : > { %368 = vmatmul.bf16.vlgmr.msra.gmra.mxu0 %v288_v16  ;;  %378 = vmatmul.bf16.vlgmr.msra.gmra.mxu2 %v290_v17 }
  0x61   : > { %373 = vmatmul.bf16.gmra.mxu0 %v289_v22  ;;  %383 = vmatmul.bf16.gmra.mxu2 %v291_v23 }
  0xce   : > { %v369_v28 = vpop.f32.mrf.mxu0 }
  0xcf   : > { %v370_v30 = vadd.f32 %v811_v29, %v369_v28 }
  0xd1   : > { %v389_v33 = vmax.f32 %v370_v30, 0.0 }
  0xd4   : > { %v379_v31 = vpop.f32.mrf.mxu2 }
  0xd5   : > { %v380_v36 = vadd.f32 %v811_v29, %v379_v31 }
  0xd6   : > { %v371_v32 = vpop.f32.mrf.mxu0 }
  0xd7   : > { %v372_v34 = vadd.f32 %v811_v29, %v371_v32  ;;  %v393_v41 = vmax.f32 %v380_v36, 0.0 }
  0xd9   : > { %v390_v35 = vmax.f32 %v372_v34, 0.0 }
  0xdb   : > { %v397_v37 = vpack.c.bf16 %v390_v35, %v389_v33 }
  0xdc   : > { %v381_v38 = vpop.f32.mrf.mxu2 }
  0xdd   : > { %v382_v39 = vadd.f32 %v811_v29, %v381_v38  ;;  %477 = vmatmul.bf16.vlgmr.msra.gmra.mxu1 %v397_v37 }
  0xde   : > { %v374_v40 = vpop.f32.mrf.mxu0 }
  0xdf   : > { %v394_v42 = vmax.f32 %v382_v39, 0.0  ;;  %v375_v44 = vadd.f32 %v811_v29, %v374_v40 }
  0xe1   : > { %v399_v43 = vpack.c.bf16 %v394_v42, %v393_v41  ;;  %v391_v47 = vmax.f32 %v375_v44, 0.0 }
  0xe3   : > { %487 = vmatmul.bf16.vlgmr.msra.gmra.mxu3 %v399_v43 }
  0xe4   : > { %v384_v45 = vpop.f32.mrf.mxu2 }
  0xe5   : > { %v385_v50 = vadd.f32 %v811_v29, %v384_v45 }
  0xe6   : > { %v376_v46 = vpop.f32.mrf.mxu0 }
  0xe7   : > { %v377_v48 = vadd.f32 %v811_v29, %v376_v46  ;;  %v395_v54 = vmax.f32 %v385_v50, 0.0 }
  0xe9   : > { %v392_v49 = vmax.f32 %v377_v48, 0.0 }
  0xeb   : > { %v398_v51 = vpack.c.bf16 %v392_v49, %v391_v47 }
  0xec   : > { %v386_v52 = vpop.f32.mrf.mxu2 }
  0xed   : > { %v387_v53 = vadd.f32 %v811_v29, %v386_v52  ;;  %482 = vmatmul.bf16.gmra.mxu1 %v398_v51 }
  0xef   : > { %v396_v55 = vmax.f32 %v387_v53, 0.0 }
  0xf1   : > { %v400_v56 = vpack.c.bf16 %v396_v55, %v395_v54 }
  0xf3   : > { %492 = vmatmul.bf16.gmra.mxu3 %v400_v56 }
 0x15a   : > { %v478_v58 = vpop.f32.mrf.mxu1 }
 0x15b   : > { %v479_v59 = vadd.f32 %v812_v57, %v478_v58 }
 0x15d   : > { %v498_v60 = vmax.f32 %v479_v59, 0.0 }
 0x15f   : > { %506 = vst [vmem:[%s1141_s11] sm:$0xff] %v498_v60 }
 0x162   : > { %v480_v61 = vpop.f32.mrf.mxu1 }
 0x163   : > { %v481_v62 = vadd.f32 %v812_v57, %v480_v61 }
 0x165   : > { %v499_v63 = vmax.f32 %v481_v62, 0.0 }
 0x166   : > { %v488_v0 = vpop.f32.mrf.mxu3 }
 0x167   : > { %507 = vst [vmem:[%s1141_s11 + $0x8] sm:$0xff] %v499_v63  ;;  %v489_v1 = vadd.f32 %v812_v57, %v488_v0 }
 0x169   : > { %v502_v2 = vmax.f32 %v489_v1, 0.0 }
 0x16a   : > { %v483_v3 = vpop.f32.mrf.mxu1 }
 0x16b   : > { %510 = vst [vmem:[%s1141_s11 + $0x20] sm:$0xff] %v502_v2  ;;  %v484_v4 = vadd.f32 %v812_v57, %v483_v3 }
 0x16d   : > { %v500_v5 = vmax.f32 %v484_v4, 0.0 }
 0x16e   : > { %v490_v6 = vpop.f32.mrf.mxu3 }
 0x16f   : > { %508 = vst [vmem:[%s1141_s11 + $0x10] sm:$0xff] %v500_v5  ;;  %v491_v7 = vadd.f32 %v812_v57, %v490_v6 }
 0x171   : > { %v503_v8 = vmax.f32 %v491_v7, 0.0 }
 0x172   : > { %v485_v9 = vpop.f32.mrf.mxu1 }
 0x173   : > { %511 = vst [vmem:[%s1141_s11 + $0x28] sm:$0xff] %v503_v8  ;;  %v486_v10 = vadd.f32 %v812_v57, %v485_v9 }
 0x175   : > { %v501_v11 = vmax.f32 %v486_v10, 0.0 }
 0x176   : > { %v493_v12 = vpop.f32.mrf.mxu3 }
 0x177   : > { %509 = vst [vmem:[%s1141_s11 + $0x18] sm:$0xff] %v501_v11  ;;  %v494_v13 = vadd.f32 %v812_v57, %v493_v12 }
 0x179   : > { %v504_v14 = vmax.f32 %v494_v13, 0.0 }
 0x17b   : > { %512 = vst [vmem:[%s1141_s11 + $0x30] sm:$0xff] %v504_v14 }
 0x17e   : > { %v495_v15 = vpop.f32.mrf.mxu3 }
 0x17f   : > { %v496_v16 = vadd.f32 %v812_v57, %v495_v15 }
 0x181   : > { %v505_v17 = vmax.f32 %v496_v16, 0.0 }
 0x183   : > { %513 = vst [vmem:[%s1141_s11 + $0x38] sm:$0xff] %v505_v17 }
 0x184   : > { %930 = shalt.err (!%p927_p10)
}
 0x185   : > { %s981_s8 = smov 128   ;;  %s982_s10 = smov 8  }
 0x186   : > { %748 = dma.vmem_to_hbm [thread:$0]  (%p1079_p3), %s528_s6, 1024, %s530_s26, %s515_s7, %s981_s8, %s981_s8, %s982_s10  }
 0x187 PF: > { %s544_s11 = sand.u32 1, %s961_s18   ;;  %p1196_p12 = scmp.ge.s32.totalorder %s973_s21, 2 }
 0x188   : > { %s545_s12 = scalar_lea.sflag [#allocation4], %s544_s11 }
 0x189   : > { %p762_p13 = pnand %p1196_p12, %p1048_p6 }
 0x18b   : > { %p763_p0 = pneg %p762_p13 }
 0x18d   : > { %956 = dma.done.wait (%p763_p0), %s545_s12, 1024  }
 0x18e   : > { %958 = vsyncadd (%p763_p0), %s545_s12, 4294966272  ;;  %p19_p5 = scmp.ge.s32.totalorder %s1069_s14, 4   ;;  %s1197_s18 = smov %s965_s19 }
 0x18f   : > { %s1198_s19 = smov %s969_s20  ;;  %s1199_s20 = smov %s1085_s23 }
 0x190   : > { %s1200_s21 = smov %s1069_s14  ;;  %21 = sbr.rel (!%p19_p5) target bundleno = 6 (0x6), region = 93 }
 0x195   :  { %551 = vsyncpa [#allocation3], 1 }
 0x196   :  { %553 = vsyncpa [#allocation3 + $0x1], 1 }
 0x197   :  { %554 = vsyncpa [#allocation6], 1 }
 0x198   :  { %555 = vsyncpa [#allocation4], 1 }
 0x199   :  { %557 = vsyncpa [#allocation4 + $0x1], 1 }

// kernel: tpu_custom_call.1
= control target key start
LH: loop header
LB: loop body
LE: loop exit
PB: predicated region body
PF: predicated region fallthrough
CT: control target
= control target key end

     0   :  { %10 = vsyncpa [#allocation3], 0  ;;  %s1185_s0 = inlined_call_operand.hbm [shape: f32[128,128], index: 0, kind: input, shape index: {}]   ;;  %s1186_s1 = inlined_call_operand.hbm [shape: bf16[128,128], index: 1, kind: input, shape index: {}]   ;;  %s1187_s2 = inlined_call_operand.vmem [shape: f32[1,128], index: 2, kind: input, shape index: {}]   ;;  %s1188_s3 = inlined_call_operand.hbm [shape: bf16[128,128], index: 3, kind: input, shape index: {}]   ;;  %s1189_s4 = inlined_call_operand.vmem [shape: f32[1,128], index: 4, kind: input, shape index: {}]   ;;  %s1190_s5 = inlined_call_operand.hbm [shape: f32[128,128], index: 5, kind: output, shape index: {}]  }
   0x1   :  { %12 = vsyncpa [#allocation3 + $0x1], 0 }
   0x2   :  { %13 = vsyncpa [#allocation6], 0 }
   0x3   :  { %14 = vsyncpa [#allocation4], 0 }
   0x4   :  { %16 = vsyncpa [#allocation4 + $0x1], 0  ;;  %s1013_s18 = smov 0   ;;  %s1015_s19 = smov 0  }
   0x5   :  { %s1017_s20 = smov 0   ;;  %s1019_s21 = smov 0  }
   0x6 LB: > { %s1034_s22 = sadd.s32 4294967295, %s973_s21   ;;  %s622_s23 = sadd.s32 4294967294, %s973_s21   ;;  %s973_s21 = sphi %s1019_s21, %s1200_s21   ;;  %s969_s20 = sphi %s1017_s20, %s1199_s20   ;;  %s965_s19 = sphi %s1015_s19, %s1198_s19   ;;  %s961_s18 = sphi %s1013_s18, %s1197_s18  }
   0x7   : > { %p42_p0 = scmp.ne.s32.totalorder %s965_s19, %s961_s18  ;;  %p43_p1 = scmp.eq.s32.totalorder %s1034_s22, 0 }
   0x8   : > { %p150_p2 = scmp.eq.s32.totalorder %s1034_s22, 1  ;;  %p156_p3 = scmp.eq.s32.totalorder %s622_s23, 1 }
   0x9   : > { %p1043_p4 = por %p43_p1, %p42_p0  ;;  %p623_p5 = scmp.ge.s32.totalorder %s973_s21, 1 }
   0xa   : > { %p1048_p6 = por %p156_p3, %p42_p0  ;;  %p163_p7 = scmp.lt.s32.totalorder %s973_s21, 3 }
   0xb   : > { %s174_s28 = sshll.u32 %s1186_s1, 4  ;;  %s975_s30 = smov [#allocation5]   ;;  %s175_s28 = int_to_ptr.hbm [resolvable:$true] %s174_s28 }
   0xc   : > { %p1056_p8 = pnand %p623_p5, %p163_p7  ;;  %s176_s6 = sshll.u32 %s975_s30, 4  ;;  %s177_s6 = int_to_ptr.vmem [resolvable:$true] %s176_s6 }
   0xd   : > { %s191_s9 = sshll.u32 %s1188_s3, 4  ;;  %s976_s10 = smov 64   ;;  %s192_s9 = int_to_ptr.hbm [resolvable:$true] %s191_s9 }
   0xe   : > { %p750_p9 = pneg %p1056_p8  ;;  %s977_s11 = smov 4  }
   0xf   : > { %s978_s12 = smov [#allocation7]   ;;  %s1069_s14 = sadd.s32 1, %s973_s21  }
  0x10   : > { %p751_p10 = pnand %p750_p9, %p43_p1  ;;  %s193_s13 = sshll.u32 %s978_s12, 4  ;;  %s194_s13 = int_to_ptr.vmem [resolvable:$true] %s193_s13 }
  0x11   : > { %s29_s15 = sadd.s32 1, %s969_s20  ;;  %s26_s16 = ssub.s32 %s973_s21, %s1069_s14 }
  0x12   : > { %753 = dma.hbm_to_vmem [thread:$0]  (!%p751_p10), %s175_s28, 1024, %s177_s6, [#allocation6], %s976_s10, %s976_s10, %s977_s11  }
  0x13   : > { %756 = dma.hbm_to_vmem [thread:$0]  (!%p751_p10), %s192_s9, 1024, %s194_s13, [#allocation6], %s976_s10, %s976_s10, %s977_s11  }
  0x14   : > { %p36_p12 = scmp.ne.s32.totalorder %s969_s20, %s965_s19  ;;  %p27_p13 = scmp.eq.s32.totalorder %s26_s16, 0 }
  0x15   : > { %p37_p0 = scmp.eq.s32.totalorder %s973_s21, 0  ;;  %p767_p5 = scmp.lt.s32.totalorder %s973_s21, 2 }
  0x16   : > { %p1079_p3 = por %p150_p2, %p36_p12  ;;  %s210_s26 = sand.u32 1, %s969_s20  }
  0x17   : > { %s1085_s23 = scalar_select %p27_p13, %s969_s20, %s29_s15  }
  0x18   : > { %p38_p7 = por %p37_p0, %p36_p12  ;;  %s627_s27 = sshll.u32 %s210_s26, 6 }
  0x19   : > { %s704_s28 = sshll.u32 %s973_s21, 6  ;;  %s214_s8 = scalar_lea.vmem [#allocation2], %s627_s27 }
  0x1a   : > { %s219_s7 = scalar_lea.hbm %s1185_s0, %s704_s28  ;;  %s222_s9 = sshll.u32 %s214_s8, 4  ;;  %s223_s9 = int_to_ptr.vmem [resolvable:$true] %s222_s9 }
  0x1b   : > { %s220_s10 = sshll.u32 %s219_s7, 4  ;;  %p1092_p2 = pnand %p767_p5, %p38_p7  ;;  %s221_s10 = int_to_ptr.hbm [resolvable:$true] %s220_s10 }
  0x1c   : > { %s211_s12 = scalar_lea.sflag [#allocation3], %s210_s26  ;;  %s873_s13 = sshra.s32 %s221_s10, 4  ;;  %s874_s13 = int_to_ptr.hbm [resolvable:$true] %s873_s13 }
  0x1d   : > { %s875_s15 = scalar_lea.hbm %s874_s13, 64  ;;  %p877_p10 = pneg %p1092_p2 }
  0x1e   : > { %p876_p9 = scmp.ne.s32.totalorder %s874_s13, %s875_s15  ;;  %s880_s28 = scalar_lea.hbm %s1185_s0, 128 }
  0x1f   : > { %p881_p0 = scmp.lt.s32.totalorder %s874_s13, %s1185_s0  ;;  %p882_p5 = scmp.lt.s32.totalorder %s880_s28, %s875_s15 }
  0x20   : > { %p878_p12 = pnand %p877_p10, %p876_p9 }
  0x21   : > { %p883_p7 = por %p882_p5, %p881_p0 }
  0x22   : > { %p879_p13 = pneg %p878_p12 }
  0x24   : > { %p884_p11 = pnand %p883_p7, %p879_p13 }
  0x26   : > { %887 = shalt.err (!%p884_p11)
}
  0x27   : > { %s979_s26 = smov 128   ;;  %s980_s7 = smov 8  }
  0x28   : > { %760 = dma.hbm_to_vmem [thread:$0]  (!%p1092_p2), %s221_s10, 1024, %s223_s9, %s211_s12, %s979_s26, %s979_s26, %s980_s7  }
  0x29   : > { %234 = sbr.rel (%p1056_p8) target bundleno = 391 (0x187), region = 40  ;;  %s1109_s8 = sand.u32 (!%p1056_p8), 1, %s965_s19  }
  0x2a   : > { %s631_s13 = sshll.u32 (!%p1056_p8), %s1109_s8, 6  ;;  %s237_s15 = scalar_lea.sflag (!%p1056_p8), [#allocation3], %s1109_s8 }
  0x2b   : > { %s1115_s16 = scalar_lea.vmem (!%p1056_p8), [#allocation2], %s631_s13 }
  0x2e   : > { %948 = dma.done.wait (%p1043_p4), %s237_s15, 1024  }
  0x2f   : > { %950 = vsyncadd (%p1043_p4), %s237_s15, 4294966272 }
  0x30   : > { %952 = dma.done.wait (%p43_p1), [#allocation6], 2048  }
  0x31   : > { %954 = vsyncadd (%p43_p1), [#allocation6], 4294965248  ;;  %v712_v0 = vld [vmem:[#allocation5 + $0x38] sm:$0xff]  ;;  %v711_v1 = vld [vmem:[#allocation5 + $0x30] sm:$0xff]  ;;  %s1141_s11 = scalar_lea.vmem [#allocation8], %s631_s13  ;;  %s721_s12 = sshll.u32 %s1034_s22, 6 }
  0x32   : > { %360 = vmatpush.bf16.msra.mxu0 %v712_v0  ;;  %722 = vmatpush.bf16.msra.mxu2 %v712_v0  ;;  %v710_v2 = vld [vmem:[#allocation5 + $0x28] sm:$0xff]  ;;  %v709_v3 = vld [vmem:[#allocation5 + $0x20] sm:$0xff]  ;;  %v708_v4 = vld [vmem:[#allocation5 + $0x18] sm:$0xff]  ;;  %s526_s30 = scalar_lea.hbm %s1190_s5, %s721_s12  ;;  %s527_s6 = sshll.u32 %s1141_s11, 4  ;;  %s528_s6 = int_to_ptr.vmem [resolvable:$true] %s527_s6 }
  0x33   : > { %v720_v5 = vld [vmem:[#allocation7 + $0x38] sm:$0xff]  ;;  %v707_v6 = vld [vmem:[#allocation5 + $0x10] sm:$0xff]  ;;  %v706_v8 = vld [vmem:[#allocation5 + $0x8] sm:$0xff]  ;;  %s529_s26 = sshll.u32 %s526_s30, 4  ;;  %s515_s7 = scalar_lea.sflag [#allocation4], %s1109_s8  ;;  %s530_s26 = int_to_ptr.hbm [resolvable:$true] %s529_s26 }
  0x34   : > { %469 = vmatpush.bf16.msra.mxu1 %v720_v5  ;;  %v719_v7 = vld [vmem:[#allocation7 + $0x30] sm:$0xff]  ;;  %730 = vmatpush.bf16.msra.mxu3 %v720_v5  ;;  %v718_v9 = vld [vmem:[#allocation7 + $0x28] sm:$0xff]  ;;  %v705_v10 = vld [vmem:[#allocation5] sm:$0xff]  ;;  %s917_s13 = sshra.s32 %s530_s26, 4  ;;  %s923_s24 = scalar_lea.hbm %s1190_s5, 128  ;;  %s918_s13 = int_to_ptr.hbm [resolvable:$true] %s917_s13 }
  0x35   : > { %v280_v11 = vld [vmem:[%s1115_s16] sm:$0xff]  ;;  %v281_v12 = vld [vmem:[%s1115_s16 + $0x8] sm:$0xff]  ;;  %v282_v18 = vld [vmem:[%s1115_s16 + $0x10] sm:$0xff]  ;;  %s919_s15 = scalar_lea.hbm %s918_s13, 64  ;;  %p924_p11 = scmp.lt.s32.totalorder %s918_s13, %s1190_s5 }
  0x36   : > { %361 = vmatpush.bf16.msra.mxu0 %v711_v1  ;;  %723 = vmatpush.bf16.msra.mxu2 %v711_v1  ;;  %v284_v13 = vld [vmem:[%s1115_s16 + $0x20] sm:$0xff]  ;;  %v285_v14 = vld [vmem:[%s1115_s16 + $0x28] sm:$0xff]  ;;  %v288_v16 = vpack.c.bf16 %v281_v12, %v280_v11  ;;  %v283_v19 = vld [vmem:[%s1115_s16 + $0x18] sm:$0xff]  ;;  %p920_p1 = scmp.ne.s32.totalorder %s918_s13, %s919_s15  ;;  %p925_p2 = scmp.lt.s32.totalorder %s923_s24, %s919_s15 }
  0x37   : > { %v717_v15 = vld [vmem:[#allocation7 + $0x20] sm:$0xff]  ;;  %v290_v17 = vpack.c.bf16 %v285_v14, %v284_v13  ;;  %v286_v20 = vld [vmem:[%s1115_s16 + $0x30] sm:$0xff]  ;;  %v287_v21 = vld [vmem:[%s1115_s16 + $0x38] sm:$0xff]  ;;  %v289_v22 = vpack.c.bf16 %v283_v19, %v282_v18 }
  0x38   : > { %470 = vmatpush.bf16.msra.mxu1 %v719_v7  ;;  %731 = vmatpush.bf16.msra.mxu3 %v719_v7  ;;  %v291_v23 = vpack.c.bf16 %v287_v21, %v286_v20  ;;  %v716_v24 = vld [vmem:[#allocation7 + $0x18] sm:$0xff]  ;;  %v715_v25 = vld [vmem:[#allocation7 + $0x10] sm:$0xff]  ;;  %v714_v26 = vld [vmem:[#allocation7 + $0x8] sm:$0xff]  ;;  %p921_p4 = pnand %p920_p1, %p1079_p3  ;;  %p926_p9 = por %p925_p2, %p924_p11 }
  0x39   : > { %v713_v27 = vld [vmem:[#allocation7] sm:$0xff] }
  0x3a   : > { %362 = vmatpush.bf16.msra.mxu0 %v710_v2  ;;  %724 = vmatpush.bf16.msra.mxu2 %v710_v2  ;;  %v811_v29 = vld [vmem:[%s1187_s2] ss:$0 sm:$0xff]  ;;  %p922_p8 = pneg %p921_p4 }
  0x3b   : > { %v812_v57 = vld [vmem:[%s1189_s4] ss:$0 sm:$0xff] }
  0x3c   : > { %471 = vmatpush.bf16.msra.mxu1 %v718_v9  ;;  %732 = vmatpush.bf16.msra.mxu3 %v718_v9  ;;  %p927_p10 = pnand %p926_p9, %p922_p8 }
  0x3e   : > { %363 = vmatpush.bf16.msra.mxu0 %v709_v3  ;;  %725 = vmatpush.bf16.msra.mxu2 %v709_v3 }
  0x40   : > { %472 = vmatpush.bf16.msra.mxu1 %v717_v15  ;;  %733 = vmatpush.bf16.msra.mxu3 %v717_v15 }
  0x42   : > { %364 = vmatpush.bf16.msra.mxu0 %v708_v4  ;;  %726 = vmatpush.bf16.msra.mxu2 %v708_v4 }
  0x44   : > { %473 = vmatpush.bf16.msra.mxu1 %v716_v24  ;;  %734 = vmatpush.bf16.msra.mxu3 %v716_v24 }
  0x46   : > { %365 = vmatpush.bf16.msra.mxu0 %v707_v6  ;;  %727 = vmatpush.bf16.msra.mxu2 %v707_v6 }
  0x48   : > { %474 = vmatpush.bf16.msra.mxu1 %v715_v25  ;;  %735 = vmatpush.bf16.msra.mxu3 %v715_v25 }
  0x4a   : > { %366 = vmatpush.bf16.msra.mxu0 %v706_v8  ;;  %728 = vmatpush.bf16.msra.mxu2 %v706_v8 }
  0x4c   : > { %475 = vmatpush.bf16.msra.mxu1 %v714_v26  ;;  %736 = vmatpush.bf16.msra.mxu3 %v714_v26 }
  0x4e   : > { %367 = vmatpush.bf16.msra.mxu0 %v705_v10  ;;  %729 = vmatpush.bf16.msra.mxu2 %v705_v10 }
  0x50   : > { %476 = vmatpush.bf16.msra.mxu1 %v713_v27  ;;  %737 = vmatpush.bf16.msra.mxu3 %v713_v27 }
  0x51   : > { %368 = vmatmul.bf16.vlgmr.msra.gmra.mxu0 %v288_v16  ;;  %378 = vmatmul.bf16.vlgmr.msra.gmra.mxu2 %v290_v17 }
  0x61   : > { %373 = vmatmul.bf16.gmra.mxu0 %v289_v22  ;;  %383 = vmatmul.bf16.gmra.mxu2 %v291_v23 }
  0xce   : > { %v369_v28 = vpop.f32.mrf.mxu0 }
  0xcf   : > { %v370_v30 = vadd.f32 %v811_v29, %v369_v28 }
  0xd1   : > { %v389_v33 = vmax.f32 %v370_v30, 0.0 }
  0xd4   : > { %v379_v31 = vpop.f32.mrf.mxu2 }
  0xd5   : > { %v380_v36 = vadd.f32 %v811_v29, %v379_v31 }
  0xd6   : > { %v371_v32 = vpop.f32.mrf.mxu0 }
  0xd7   : > { %v372_v34 = vadd.f32 %v811_v29, %v371_v32  ;;  %v393_v41 = vmax.f32 %v380_v36, 0.0 }
  0xd9   : > { %v390_v35 = vmax.f32 %v372_v34, 0.0 }
  0xdb   : > { %v397_v37 = vpack.c.bf16 %v390_v35, %v389_v33 }
  0xdc   : > { %v381_v38 = vpop.f32.mrf.mxu2 }
  0xdd   : > { %v382_v39 = vadd.f32 %v811_v29, %v381_v38  ;;  %477 = vmatmul.bf16.vlgmr.msra.gmra.mxu1 %v397_v37 }
  0xde   : > { %v374_v40 = vpop.f32.mrf.mxu0 }
  0xdf   : > { %v394_v42 = vmax.f32 %v382_v39, 0.0  ;;  %v375_v44 = vadd.f32 %v811_v29, %v374_v40 }
  0xe1   : > { %v399_v43 = vpack.c.bf16 %v394_v42, %v393_v41  ;;  %v391_v47 = vmax.f32 %v375_v44, 0.0 }
  0xe3   : > { %487 = vmatmul.bf16.vlgmr.msra.gmra.mxu3 %v399_v43 }
  0xe4   : > { %v384_v45 = vpop.f32.mrf.mxu2 }
  0xe5   : > { %v385_v50 = vadd.f32 %v811_v29, %v384_v45 }
  0xe6   : > { %v376_v46 = vpop.f32.mrf.mxu0 }
  0xe7   : > { %v377_v48 = vadd.f32 %v811_v29, %v376_v46  ;;  %v395_v54 = vmax.f32 %v385_v50, 0.0 }
  0xe9   : > { %v392_v49 = vmax.f32 %v377_v48, 0.0 }
  0xeb   : > { %v398_v51 = vpack.c.bf16 %v392_v49, %v391_v47 }
  0xec   : > { %v386_v52 = vpop.f32.mrf.mxu2 }
  0xed   : > { %v387_v53 = vadd.f32 %v811_v29, %v386_v52  ;;  %482 = vmatmul.bf16.gmra.mxu1 %v398_v51 }
  0xef   : > { %v396_v55 = vmax.f32 %v387_v53, 0.0 }
  0xf1   : > { %v400_v56 = vpack.c.bf16 %v396_v55, %v395_v54 }
  0xf3   : > { %492 = vmatmul.bf16.gmra.mxu3 %v400_v56 }
 0x15a   : > { %v478_v58 = vpop.f32.mrf.mxu1 }
 0x15b   : > { %v479_v59 = vadd.f32 %v812_v57, %v478_v58 }
 0x15d   : > { %v498_v60 = vmax.f32 %v479_v59, 0.0 }
 0x15f   : > { %506 = vst [vmem:[%s1141_s11] sm:$0xff] %v498_v60 }
 0x162   : > { %v480_v61 = vpop.f32.mrf.mxu1 }
 0x163   : > { %v481_v62 = vadd.f32 %v812_v57, %v480_v61 }
 0x165   : > { %v499_v63 = vmax.f32 %v481_v62, 0.0 }
 0x166   : > { %v488_v0 = vpop.f32.mrf.mxu3 }
 0x167   : > { %507 = vst [vmem:[%s1141_s11 + $0x8] sm:$0xff] %v499_v63  ;;  %v489_v1 = vadd.f32 %v812_v57, %v488_v0 }
 0x169   : > { %v502_v2 = vmax.f32 %v489_v1, 0.0 }
 0x16a   : > { %v483_v3 = vpop.f32.mrf.mxu1 }
 0x16b   : > { %510 = vst [vmem:[%s1141_s11 + $0x20] sm:$0xff] %v502_v2  ;;  %v484_v4 = vadd.f32 %v812_v57, %v483_v3 }
 0x16d   : > { %v500_v5 = vmax.f32 %v484_v4, 0.0 }
 0x16e   : > { %v490_v6 = vpop.f32.mrf.mxu3 }
 0x16f   : > { %508 = vst [vmem:[%s1141_s11 + $0x10] sm:$0xff] %v500_v5  ;;  %v491_v7 = vadd.f32 %v812_v57, %v490_v6 }
 0x171   : > { %v503_v8 = vmax.f32 %v491_v7, 0.0 }
 0x172   : > { %v485_v9 = vpop.f32.mrf.mxu1 }
 0x173   : > { %511 = vst [vmem:[%s1141_s11 + $0x28] sm:$0xff] %v503_v8  ;;  %v486_v10 = vadd.f32 %v812_v57, %v485_v9 }
 0x175   : > { %v501_v11 = vmax.f32 %v486_v10, 0.0 }
 0x176   : > { %v493_v12 = vpop.f32.mrf.mxu3 }
 0x177   : > { %509 = vst [vmem:[%s1141_s11 + $0x18] sm:$0xff] %v501_v11  ;;  %v494_v13 = vadd.f32 %v812_v57, %v493_v12 }
 0x179   : > { %v504_v14 = vmax.f32 %v494_v13, 0.0 }
 0x17b   : > { %512 = vst [vmem:[%s1141_s11 + $0x30] sm:$0xff] %v504_v14 }
 0x17e   : > { %v495_v15 = vpop.f32.mrf.mxu3 }
 0x17f   : > { %v496_v16 = vadd.f32 %v812_v57, %v495_v15 }
 0x181   : > { %v505_v17 = vmax.f32 %v496_v16, 0.0 }
 0x183   : > { %513 = vst [vmem:[%s1141_s11 + $0x38] sm:$0xff] %v505_v17 }
 0x184   : > { %930 = shalt.err (!%p927_p10)
}
 0x185   : > { %s981_s8 = smov 128   ;;  %s982_s10 = smov 8  }
 0x186   : > { %748 = dma.vmem_to_hbm [thread:$0]  (%p1079_p3), %s528_s6, 1024, %s530_s26, %s515_s7, %s981_s8, %s981_s8, %s982_s10  }
 0x187 PF: > { %s544_s11 = sand.u32 1, %s961_s18   ;;  %p1196_p12 = scmp.ge.s32.totalorder %s973_s21, 2 }
 0x188   : > { %s545_s12 = scalar_lea.sflag [#allocation4], %s544_s11 }
 0x189   : > { %p762_p13 = pnand %p1196_p12, %p1048_p6 }
 0x18b   : > { %p763_p0 = pneg %p762_p13 }
 0x18d   : > { %956 = dma.done.wait (%p763_p0), %s545_s12, 1024  }
 0x18e   : > { %958 = vsyncadd (%p763_p0), %s545_s12, 4294966272  ;;  %p19_p5 = scmp.ge.s32.totalorder %s1069_s14, 4   ;;  %s1197_s18 = smov %s965_s19 }
 0x18f   : > { %s1198_s19 = smov %s969_s20  ;;  %s1199_s20 = smov %s1085_s23 }
 0x190   : > { %s1200_s21 = smov %s1069_s14  ;;  %21 = sbr.rel (!%p19_p5) target bundleno = 6 (0x6), region = 93 }
 0x195   :  { %551 = vsyncpa [#allocation3], 1 }
 0x196   :  { %553 = vsyncpa [#allocation3 + $0x1], 1 }
 0x197   :  { %554 = vsyncpa [#allocation6], 1 }
 0x198   :  { %555 = vsyncpa [#allocation4], 1 }
 0x199   :  { %557 = vsyncpa [#allocation4 + $0x1], 1 }

</bundles_post_ra>
